<compile_context>
chip_gen: v7x
topology: tpu7x:2x2x1
jax: 0.10.0
libtpu: 0.0.40
codegen_flags: <defaults>
</compile_context>

<pallas_src>
import jax
import jax.numpy as jnp
from jax.experimental import pallas as pl
from jax.experimental.pallas import tpu as pltpu


# --------------------------------------------------------------------------- kernel
def molecule_prediction_kernel(x_ref, we_ref, be_ref, w1_ref, b1_ref, w2_ref, b2_ref,
                               out_ref):
    # x_ref:   (TB*N_atoms, F) bf16  -- pre-flattened in the wrapper (no in-kernel relayout)
    # out_ref: (1, TB) f32           -- lane-dense output row
    M, F = x_ref.shape
    He = we_ref.shape[1]
    TB = out_ref.shape[1]
    N = M // TB

    # ---- embedding stand-in: per-atom Linear -> ReLU -> pool over atoms ----
    # One 2-D MXU matmul with M = TB*N rows.
    # TODO(synk): if this ever becomes compute-bound, pack 4 atoms per row (F=32 -> 128)
    #             with a block-diagonal we to fill MXU depth and kill x's 4x lane padding.
    h = jnp.dot(x_ref[...], we_ref[...], preferred_element_type=jnp.float32)   # (M, He) f32
    h = jnp.maximum(h + be_ref[...], 0.0)
    # sum-pool over atoms; the 1/N_atoms of the original mean-pool is folded into w1.
    emb = jnp.sum(h.reshape(TB, N, He), axis=1)                                 # (TB, He) f32

    # ---- prediction head: Linear -> ReLU ----
    z = jnp.dot(emb.astype(w1_ref.dtype), w1_ref[...],
                preferred_element_type=jnp.float32) + b1_ref[...]               # (TB, Hd) f32
    z = jnp.maximum(z, 0.0)

    # ---- final Linear(Hd -> 1): contract against the (1, Hd) w2 row and emit the
    # result directly as a lane-dense (1, TB) block (no (TB,1) masked partial stores).
    # TODO(synk): for output_dim > 1 this generalizes to an (Od, Hd) x (TB, Hd)^T matmul.
    pred = jax.lax.dot_general(
        w2_ref[...], z.astype(w2_ref.dtype),
        dimension_numbers=(((1,), (1,)), ((), ())),
        preferred_element_type=jnp.float32) + b2_ref[0, 0]                      # (1, TB) f32
    out_ref[...] = pred.astype(out_ref.dtype)


# --------------------------------------------------------------------- tile selection
def _tpu_generation_cfg():
    kind = ""
    try:
        kind = jax.devices()[0].device_kind.lower()
    except Exception:
        pass
    if "v5" in kind:
        # v5e: ~0.82 TB/s HBM saturates earlier; 16 MiB default scoped VMEM -> modest tiles.
        return dict(tb_cap=1024, tile_budget=12 << 20, vmem_cap=64 << 20)
    if "v7" in kind:
        # v7x: only 64 MiB physical VMEM per TC; also want >= 2 grid steps for its 2 TCs.
        return dict(tb_cap=2048, tile_budget=24 << 20, vmem_cap=48 << 20)
    # v6e / v4 / default (128 MiB physical VMEM)
    return dict(tb_cap=4096, tile_budget=28 << 20, vmem_cap=96 << 20)


def _vmem_tile_bytes(tb, n_atoms, feat_dim, emb_hidden, head_hidden):
    """Conservative per-step VMEM footprint: lane-padded double-buffered x tile, the f32
    intermediates (h, emb, z), the double-buffered output row and the resident weights."""
    pad = lambda n: -(-n // 128) * 128
    f_p, he_p, hd_p = pad(feat_dim), pad(emb_hidden), pad(head_hidden)
    x_tile = 2 * tb * n_atoms * f_p * 2            # double-buffered bf16 x block (lane-padded)
    h_f32 = tb * n_atoms * he_p * 4                # (TB*N, He) embedding intermediate
    emb_f32 = tb * he_p * 4
    z_f32 = tb * hd_p * 4
    out_row = 2 * pad(tb) * 4                      # double-buffered (1, TB) f32 output row
    weights = 2 * (f_p * he_p * 2 + he_p * hd_p * 2 + hd_p * 2 + (he_p + hd_p) * 4 + 128)
    return x_tile + h_f32 + emb_f32 + z_f32 + out_row + weights


def _pick_batch_tile(B, n_atoms, feat_dim, emb_hidden, head_hidden, cfg):
    """Largest 128-aligned batch tile that divides B and fits the per-step VMEM budget;
    prefers a grid of >= 2 steps so ("parallel",) can use both TensorCores on v7x."""
    candidates = [t for t in (8192, 4096, 2048, 1024, 512, 256, 128) if t <= cfg["tb_cap"]]
    fits = [t for t in candidates
            if B % t == 0
            and _vmem_tile_bytes(t, n_atoms, feat_dim, emb_hidden, head_hidden)
            <= cfg["tile_budget"]]
    if not fits:
        return B                        # small batch: one program, blocks == full arrays
    for t in fits:                      # descending; first with >= 2 grid steps
        if B // t >= 2:
            return t
    return fits[0]


# --------------------------------------------------------------------------- wrapper
def molecule_prediction_model(x, prepped_params, *, batch_tile=None):
    we, be, w1, b1, w2, b2 = prepped_params
    B, N, F = x.shape
    He = we.shape[1]
    Hd = w1.shape[1]

    cfg = _tpu_generation_cfg()
    TB = batch_tile or _pick_batch_tile(B, N, F, He, Hd, cfg)
    assert B % TB == 0, f"batch tile {TB} must divide batch {B}"
    grid = (B // TB,)

    est = _vmem_tile_bytes(TB, N, F, He, Hd)
    vmem_limit = int(min(cfg["vmem_cap"], max(32 << 20, int(1.5 * est) + (4 << 20))))

    # Flatten atoms into the row dim *outside* the kernel (free XLA reshape of a
    # contiguous array): removes the per-step in-kernel reshape/relayout of the x tile
    # and its sublane padding.
    x2d = x.reshape(B * N, F)

    const2 = lambda i: (0, 0)  # weights/biases: same block every step -> VMEM-resident
    # TODO(synk): on v7x, pipeline_mode=pl.Buffered(1) on these constant-index specs
    #             would drop their unused second pipeline buffer (~100 KB of VMEM).

    out_row = pl.pallas_call(
        molecule_prediction_kernel,
        out_shape=jax.ShapeDtypeStruct((1, B), jnp.float32),
        grid=grid,
        in_specs=[
            pl.BlockSpec((TB * N, F), lambda i: (i, 0)),           # x: batch-tiled, 2-D
            pl.BlockSpec((F, He), const2),                         # we  (bf16)
            pl.BlockSpec((1, He), const2),                         # be  (f32)
            pl.BlockSpec((He, Hd), const2),                        # w1  (bf16, 1/N folded)
            pl.BlockSpec((1, Hd), const2),                         # b1  (f32)
            pl.BlockSpec((1, Hd), const2),                         # w2 row (bf16)
            pl.BlockSpec(memory_space=pltpu.MemorySpace.SMEM),     # b2 scalar (1,1) in SMEM
        ],
        out_specs=pl.BlockSpec((1, TB), lambda i: (0, i)),         # lane-dense output row
        compiler_params=pltpu.CompilerParams(
            dimension_semantics=("parallel",),                     # megacore on v7x
            vmem_limit_bytes=vmem_limit,
        ),
    )(x2d, we, be, w1, b1, w2, b2)

    return out_row.reshape(B, 1)


# ------------------------------------------------------------------------ parameters
def init_params(key, feat_dim, emb_hidden, head_hidden):
    """'Module-style' f32 parameters (output_dim fixed to 1, the module default)."""
    ks = jax.random.split(key, 6)
    scale = lambda fan_in: 1.0 / jnp.sqrt(jnp.float32(fan_in))
    we = jax.random.normal(ks[0], (feat_dim, emb_hidden), jnp.float32) * scale(feat_dim)
    be = jax.random.normal(ks[1], (1, emb_hidden), jnp.float32) * 0.01
    w1 = jax.random.normal(ks[2], (emb_hidden, head_hidden), jnp.float32) * scale(emb_hidden)
    b1 = jax.random.normal(ks[3], (1, head_hidden), jnp.float32) * 0.01
    w2 = jax.random.normal(ks[4], (head_hidden, 1), jnp.float32) * scale(head_hidden)
    b2 = jax.random.normal(ks[5], (1, 1), jnp.float32) * 0.01
    return we, be, w1, b1, w2, b2


def prepare_params(raw_params, n_atoms):
    """One-time prep: bf16 weights for the MXU, fold mean-pool 1/N into w1 (exact),
    lay the (Hd, 1) final weight out as a (1, Hd) lane-dense row."""
    we, be, w1, b1, w2, b2 = raw_params
    we_bf = we.astype(jnp.bfloat16)
    w1_bf = (w1 / jnp.float32(n_atoms)).astype(jnp.bfloat16)
    w2_row = w2.reshape(1, -1).astype(jnp.bfloat16)
    return we_bf, be, w1_bf, b1, w2_row, b2


def reference_forward(x_bf16, prepped_params):
    """Pure-JAX reference mirroring the kernel's quantization points (f32 accumulation)."""
    we, be, w1, b1, w2_row, b2 = prepped_params
    xf = x_bf16.astype(jnp.float32)
    h = jnp.maximum(jnp.einsum("bnf,fh->bnh", xf, we.astype(jnp.float32)) + be, 0.0)
    emb = jnp.sum(h, axis=1)
    embq = emb.astype(jnp.bfloat16).astype(jnp.float32)
    z = jnp.maximum(embq @ w1.astype(jnp.float32) + b1, 0.0)
    zq = z.astype(jnp.bfloat16).astype(jnp.float32)
    return jnp.sum(zq * w2_row.astype(jnp.float32), axis=-1, keepdims=True) + b2[0, 0]


if __name__ == "__main__":
    B, N_ATOMS, FEAT_DIM = 2, 8, 32        # small molecule batch
    EMB_HIDDEN = 128                        # embedding width (multiple of 128 lanes)
    HEAD_HIDDEN = 128                       # hidden_dim of the prediction head

    key = jax.random.PRNGKey(0)
    k_x, k_p = jax.random.split(key)
    x = jax.random.normal(k_x, (B, N_ATOMS, FEAT_DIM), jnp.float32).astype(jnp.bfloat16)

    raw = init_params(k_p, FEAT_DIM, EMB_HIDDEN, HEAD_HIDDEN)
    prepped = prepare_params(raw, N_ATOMS)

    out = jax.jit(molecule_prediction_model)(x, prepped)
    jax.block_until_ready(out)

    ref = reference_forward(x, prepped)
    assert out.shape == (B, 1)
    assert jnp.allclose(out, ref, atol=1e-3, rtol=1e-3), "mismatch vs reference"
    print("KERNEL_OK")
</pallas_src>

<mosaic_0001>
module attributes {stable_mosaic.version = 11 : i64} {
  func.func @molecule_prediction_kernel(%arg0: i32, %arg1: memref<16x32xbf16, #tpu.memory_space<vmem>>, %arg2: memref<32x128xbf16, #tpu.memory_space<vmem>>, %arg3: memref<1x128xf32, #tpu.memory_space<vmem>>, %arg4: memref<128x128xbf16, #tpu.memory_space<vmem>>, %arg5: memref<1x128xf32, #tpu.memory_space<vmem>>, %arg6: memref<1x128xbf16, #tpu.memory_space<vmem>>, %arg7: memref<1x1xf32, #tpu.memory_space<smem>>, %arg8: memref<1x2xf32, #tpu.memory_space<vmem>>) attributes {dimension_semantics = [#tpu.dimension_semantics<parallel>], iteration_bounds = array<i64: 1>, scalar_prefetch = 0 : i64, scratch_operands = 0 : i64, tpu.core_type = #tpu.core_type<tc>, window_params = [{transform_indices = @transform_0, window_bounds = array<i64: 16, 32>}, {pipeline_mode = #tpu.pipeline_mode<synchronous>, transform_indices = @transform_1, window_bounds = array<i64: 32, 128>}, {pipeline_mode = #tpu.pipeline_mode<synchronous>, transform_indices = @transform_2, window_bounds = array<i64: 1, 128>}, {pipeline_mode = #tpu.pipeline_mode<synchronous>, transform_indices = @transform_3, window_bounds = array<i64: 128, 128>}, {pipeline_mode = #tpu.pipeline_mode<synchronous>, transform_indices = @transform_4, window_bounds = array<i64: 1, 128>}, {pipeline_mode = #tpu.pipeline_mode<synchronous>, transform_indices = @transform_5, window_bounds = array<i64: 1, 128>}, {transform_indices = @transform_6, window_bounds = array<i64: 1, 1>}, {transform_indices = @transform_7, window_bounds = array<i64: 1, 2>}]} {
    %c0 = arith.constant 0 : index
    %c0_0 = arith.constant 0 : index
    %0 = vector.load %arg1[%c0, %c0_0] : memref<16x32xbf16, #tpu.memory_space<vmem>>, vector<16x32xbf16>
    %c0_1 = arith.constant 0 : index
    %c0_2 = arith.constant 0 : index
    %1 = vector.load %arg2[%c0_1, %c0_2] : memref<32x128xbf16, #tpu.memory_space<vmem>>, vector<32x128xbf16>
    %cst = arith.constant dense<0.000000e+00> : vector<16x128xf32>
    %2 = tpu.matmul %0, %1, %cst {dimension_numbers = #tpu.dot_dimension_numbers<[1], [0], [0], [1], [0, 0, 1, 1], [], []>} : vector<16x32xbf16>, vector<32x128xbf16>, vector<16x128xf32> -> vector<16x128xf32>
    %c0_3 = arith.constant 0 : index
    %c0_4 = arith.constant 0 : index
    %3 = vector.load %arg3[%c0_3, %c0_4] : memref<1x128xf32, #tpu.memory_space<vmem>>, vector<1x128xf32>
    %4 = vector.broadcast %3 : vector<1x128xf32> to vector<16x128xf32>
    %5 = arith.addf %2, %4 : vector<16x128xf32>
    %cst_5 = arith.constant 0.000000e+00 : f32
    %6 = vector.broadcast %cst_5 : f32 to vector<16x128xf32>
    %7 = arith.maximumf %5, %6 : vector<16x128xf32>
    %8 = vector.shape_cast %7 : vector<16x128xf32> to vector<2x8x128xf32>
    %cst_6 = arith.constant dense<0.000000e+00> : vector<2x128xf32>
    %9 = vector.multi_reduction <add>, %8, %cst_6 [1] : vector<2x8x128xf32> to vector<2x128xf32>
    %10 = arith.truncf %9 : vector<2x128xf32> to vector<2x128xbf16>
    %c0_7 = arith.constant 0 : index
    %c0_8 = arith.constant 0 : index
    %11 = vector.load %arg4[%c0_7, %c0_8] : memref<128x128xbf16, #tpu.memory_space<vmem>>, vector<128x128xbf16>
    %cst_9 = arith.constant dense<0.000000e+00> : vector<2x128xf32>
    %12 = tpu.matmul %10, %11, %cst_9 {dimension_numbers = #tpu.dot_dimension_numbers<[1], [0], [0], [1], [0, 0, 1, 1], [], []>} : vector<2x128xbf16>, vector<128x128xbf16>, vector<2x128xf32> -> vector<2x128xf32>
    %c0_10 = arith.constant 0 : index
    %c0_11 = arith.constant 0 : index
    %13 = vector.load %arg5[%c0_10, %c0_11] : memref<1x128xf32, #tpu.memory_space<vmem>>, vector<1x128xf32>
    %14 = vector.broadcast %13 : vector<1x128xf32> to vector<2x128xf32>
    %15 = arith.addf %12, %14 : vector<2x128xf32>
    %cst_12 = arith.constant 0.000000e+00 : f32
    %16 = vector.broadcast %cst_12 : f32 to vector<2x128xf32>
    %17 = arith.maximumf %15, %16 : vector<2x128xf32>
    %c0_13 = arith.constant 0 : index
    %c0_14 = arith.constant 0 : index
    %18 = vector.load %arg6[%c0_13, %c0_14] : memref<1x128xbf16, #tpu.memory_space<vmem>>, vector<1x128xbf16>
    %19 = arith.truncf %17 : vector<2x128xf32> to vector<2x128xbf16>
    %cst_15 = arith.constant dense<0.000000e+00> : vector<1x2xf32>
    %20 = tpu.matmul %18, %19, %cst_15 {dimension_numbers = #tpu.dot_dimension_numbers<[1], [1], [0], [0], [0, 0, 1, 0], [], []>} : vector<1x128xbf16>, vector<2x128xbf16>, vector<1x2xf32> -> vector<1x2xf32>
    %c0_16 = arith.constant 0 : index
    %c0_17 = arith.constant 0 : index
    %21 = memref.load %arg7[%c0_16, %c0_17] : memref<1x1xf32, #tpu.memory_space<smem>>
    %22 = vector.broadcast %21 : f32 to vector<1x2xf32>
    %23 = arith.addf %20, %22 : vector<1x2xf32>
    %c0_18 = arith.constant 0 : index
    %c0_19 = arith.constant 0 : index
    %24 = vector.load %arg8[%c0_18, %c0_19] : memref<1x2xf32, #tpu.memory_space<vmem>>, vector<1x2xf32>
    tpu.vector_store %arg8[%c0_18, %c0_19], %23 {strides = array<i32>} : memref<1x2xf32, #tpu.memory_space<vmem>>, vector<1x2xf32>,
    return
  }
  func.func @transform_0(%arg0: i32) -> (i32, i32) {
    %c0_i32 = arith.constant 0 : i32
    %c0_i32_0 = arith.constant 0 : i32
    return %arg0, %c0_i32 : i32, i32
  }
  func.func @transform_1(%arg0: i32) -> (i32, i32) {
    %c0_i32 = arith.constant 0 : i32
    %c0_i32_0 = arith.constant 0 : i32
    %c0_i32_1 = arith.constant 0 : i32
    return %c0_i32, %c0_i32_0 : i32, i32
  }
  func.func @transform_2(%arg0: i32) -> (i32, i32) {
    %c0_i32 = arith.constant 0 : i32
    %c0_i32_0 = arith.constant 0 : i32
    %c0_i32_1 = arith.constant 0 : i32
    return %c0_i32, %c0_i32_0 : i32, i32
  }
  func.func @transform_3(%arg0: i32) -> (i32, i32) {
    %c0_i32 = arith.constant 0 : i32
    %c0_i32_0 = arith.constant 0 : i32
    %c0_i32_1 = arith.constant 0 : i32
    return %c0_i32, %c0_i32_0 : i32, i32
  }
  func.func @transform_4(%arg0: i32) -> (i32, i32) {
    %c0_i32 = arith.constant 0 : i32
    %c0_i32_0 = arith.constant 0 : i32
    %c0_i32_1 = arith.constant 0 : i32
    return %c0_i32, %c0_i32_0 : i32, i32
  }
  func.func @transform_5(%arg0: i32) -> (i32, i32) {
    %c0_i32 = arith.constant 0 : i32
    %c0_i32_0 = arith.constant 0 : i32
    %c0_i32_1 = arith.constant 0 : i32
    return %c0_i32, %c0_i32_0 : i32, i32
  }
  func.func @transform_6(%arg0: i32) -> (i32, i32) {
    %c0_i32 = arith.constant 0 : i32
    %c0_i32_0 = arith.constant 0 : i32
    %c0_i32_1 = arith.constant 0 : i32
    return %c0_i32, %c0_i32_0 : i32, i32
  }
  func.func @transform_7(%arg0: i32) -> (i32, i32) {
    %c0_i32 = arith.constant 0 : i32
    %c0_i32_0 = arith.constant 0 : i32
    return %c0_i32, %arg0 : i32, i32
  }
}

</mosaic_0001>

<bundles_post_ra>
// kernel: molecule_prediction_model.1
= control target key start
LH: loop header
LB: loop body
LE: loop exit
PB: predicated region body
PF: predicated region fallthrough
CT: control target
= control target key end

     0   :  { %13 = vsyncpa [#allocation4], 0  ;;  %s645_s0 = inlined_call_operand.hbm [shape: bf16[16,32], index: 0, kind: input, shape index: {}]   ;;  %s646_s1 = inlined_call_operand.hbm [shape: bf16[32,128], index: 1, kind: input, shape index: {}]   ;;  %s647_s2 = inlined_call_operand.vmem [shape: f32[1,128], index: 2, kind: input, shape index: {}]   ;;  %s648_s3 = inlined_call_operand.hbm [shape: bf16[128,128], index: 3, kind: input, shape index: {}]   ;;  %s649_s4 = inlined_call_operand.vmem [shape: f32[1,128], index: 4, kind: input, shape index: {}]   ;;  %s650_s5 = inlined_call_operand.vmem [shape: bf16[1,128], index: 5, kind: input, shape index: {}]   ;;  %s651_s6 = inlined_call_operand.<no memory space> [shape: f32[1,1], index: 6, kind: input, shape index: {}]   ;;  %s652_s7 = inlined_call_operand.hbm [shape: f32[1,2], index: 7, kind: output, shape index: {}]  }
   0x1   :  { %14 = vsyncpa [#allocation7], 0 }
   0x2   :  { %15 = vsyncpa [#allocation5], 0  ;;  %s518_s24 = smov [#allocation6]   ;;  %s519_s26 = smov [#allocation3]  }
   0x3   :  { %s33_s25 = sshll.u32 %s518_s24, 4  ;;  %s21_s27 = sshll.u32 %s519_s26, 4  ;;  %s34_s25 = int_to_ptr.vmem [resolvable:$true] %s33_s25  ;;  %s566_s27 = int_to_ptr.vmem [resolvable:$true] %s21_s27 }
   0x4   :  { %s424_s30 = scalar_lea.hbm %s646_s1, 256 }
   0x5   :  { %p425_p0 = scmp.ne.s32.totalorder %s646_s1, %s424_s30  ;;  %p428_p1 = scmp.lt.u32.totalorder %s424_s30, %s646_s1 }
   0x7   :  { %p430_p2 = pnand %p428_p1, %p425_p0 }
   0x9   :  { %433 = shalt.err (!%p430_p2)
}
   0xa   :  { %s434_s12 = scalar_lea.vmem %s34_s25, 256  ;;  %p439_p4 = scmp.lt.s32.totalorder %s34_s25, %s34_s25 }
   0xb   :  { %p435_p3 = scmp.ne.s32.totalorder %s34_s25, %s434_s12  ;;  %p440_p5 = scmp.lt.s32.totalorder %s434_s12, %s434_s12 }
   0xd   :  { %p441_p6 = por %p440_p5, %p439_p4 }
   0xf   :  { %p442_p7 = pnand %p441_p6, %p435_p3 }
  0x11   :  { %445 = shalt.err (!%p442_p7)
}
  0x12   :  { %s520_s13 = smov 64   ;;  %s521_s14 = smov 4  }
  0x13   :  { %39 = dma.hbm_to_vmem [thread:$0]  %s646_s1, 256, %s34_s25, [#allocation7], %s520_s13, %s520_s13, %s521_s14  }
  0x14   :  { %s446_s19 = scalar_lea.hbm %s645_s0, 128 }
  0x15   :  { %p447_p8 = scmp.ne.s32.totalorder %s645_s0, %s446_s19  ;;  %p450_p9 = scmp.lt.u32.totalorder %s446_s19, %s645_s0 }
  0x17   :  { %p452_p10 = pnand %p450_p9, %p447_p8 }
  0x19   :  { %455 = shalt.err (!%p452_p10)
}
  0x1a   :  { %s456_s24 = scalar_lea.vmem %s566_s27, 128  ;;  %p461_p12 = scmp.lt.s32.totalorder %s566_s27, %s566_s27 }
  0x1b   :  { %p457_p11 = scmp.ne.s32.totalorder %s566_s27, %s456_s24  ;;  %p462_p13 = scmp.lt.s32.totalorder %s456_s24, %s456_s24 }
  0x1d   :  { %p463_p0 = por %p462_p13, %p461_p12 }
  0x1f   :  { %p464_p1 = pnand %p463_p0, %p457_p11 }
  0x21   :  { %467 = shalt.err (!%p464_p1)
}
  0x22   :  { %27 = dma.hbm_to_vmem [thread:$0]  %s645_s0, 128, %s566_s27, [#allocation4], %s520_s13, %s520_s13, %s521_s14  }
  0x23   :  { %s522_s26 = smov [#allocation8]   ;;  %s468_s8 = scalar_lea.hbm %s648_s3, 1024 }
  0x24   :  { %s47_s28 = sshll.u32 %s522_s26, 4  ;;  %p469_p2 = scmp.ne.s32.totalorder %s648_s3, %s468_s8  ;;  %s48_s28 = int_to_ptr.vmem [resolvable:$true] %s47_s28 }
  0x25   :  { %p472_p3 = scmp.lt.u32.totalorder %s468_s8, %s648_s3 }
  0x27   :  { %p474_p4 = pnand %p472_p3, %p469_p2 }
  0x29   :  { %477 = shalt.err (!%p474_p4)
}
  0x2a   :  { %s478_s15 = scalar_lea.vmem %s48_s28, 1024  ;;  %p483_p6 = scmp.lt.s32.totalorder %s48_s28, %s48_s28 }
  0x2b   :  { %p479_p5 = scmp.ne.s32.totalorder %s48_s28, %s478_s15  ;;  %p484_p7 = scmp.lt.s32.totalorder %s478_s15, %s478_s15 }
  0x2d   :  { %p485_p8 = por %p484_p7, %p483_p6 }
  0x2f   :  { %p486_p9 = pnand %p485_p8, %p479_p5 }
  0x31   :  { %489 = shalt.err (!%p486_p9)
}
  0x32   :  { %53 = dma.hbm_to_vmem [thread:$0]  %s648_s3, 1024, %s48_s28, [#allocation7], %s520_s13, %s520_s13, %s521_s14  }
  0x33   :  { %512 = dma.done.wait [#allocation4], 128  }
  0x34   :  { %513 = vsyncadd [#allocation4], 4294967168 }
  0x35   :  { %514 = dma.done.wait [#allocation7], 1280  }
  0x36   :  { %515 = vsyncadd [#allocation7], 4294966016  ;;  %v523_v0 = vmov 0.0   ;;  %vm524_vm0 = vmmov 0   ;;  %v413_v1 = vld [vmem:[#allocation6] sm:$0xff]   ;;  %v414_v2 = vld [vmem:[#allocation6 + $0x8] sm:$0xff]   ;;  %v284_v48 = vstv %s651_s6 }
  0x37   :  { %371 = vmatprep.subr.bf16.mxu0 %v523_v0  ;;  %375 = vmatprep.mubr.msk.bf16.mxu0 %vm524_vm0, %v523_v0  ;;  %v416_v3 = vld [vmem:[#allocation8] sm:$0xff]   ;;  %v415_v4 = vld [vmem:[#allocation3] sm:$0xff]   ;;  %vm100_vm1 = vcmask 261120   ;;  %v418_v6 = vld [vmem:[#allocation8 + $0x10] sm:$0xff]   ;;  %vm188_vm2 = vcmask 1041409   ;;  %s525_s20 = smov [#allocation9]  }
  0x38   :  { %379 = vmatprep.subr.bf16.mxu1 %v523_v0  ;;  %395 = vmatprep.mubr.msk.bf16.mxu1 %vm524_vm0, %v523_v0  ;;  %v417_v5 = vld [vmem:[#allocation8 + $0x8] sm:$0xff]   ;;  %v419_v7 = vld [vmem:[#allocation8 + $0x18] sm:$0xff]   ;;  %v420_v8 = vld [vmem:[#allocation8 + $0x20] sm:$0xff]   ;;  %s333_s21 = sshll.u32 %s525_s20, 4  ;;  %vm325_vm3 = vcmask 8192   ;;  %s334_s21 = int_to_ptr.vmem [resolvable:$true] %s333_s21 }
  0x39   :  { %372 = vmatpush3.bf16.msra.mxu0 %v413_v1  ;;  %380 = vmatpush3.bf16.msra.mxu1 %v416_v3  ;;  %v421_v9 = vld [vmem:[#allocation8 + $0x28] sm:$0xff]   ;;  %v422_v10 = vld [vmem:[#allocation8 + $0x30] sm:$0xff]   ;;  %v423_v11 = vld [vmem:[#allocation8 + $0x38] sm:$0xff]   ;;  %s494_s22 = scalar_lea.vmem %s334_s21, 32  ;;  %p495_p11 = scmp.lt.s32.totalorder %s334_s21, %s334_s21 }
  0x3a   :  { %373 = vmatprep.subr.bf16.mxu0 %v523_v0  ;;  %381 = vmatprep.subr.bf16.mxu1 %v523_v0  ;;  %v343_v12 = vld [vmem:[%s647_s2] ss:$0 sm:$0xff] }
  0x3b   :  { %v348_v39 = vld [vmem:[%s649_s4] ss:$0 sm:$0xff]  ;;  %s490_s4 = scalar_lea.vmem %s334_s21, 16 }
  0x3c   :  { %v281_v47 = vld [vmem:[%s650_s5] sm:$0x1]  ;;  %p491_p10 = scmp.ne.s32.totalorder %s334_s21, %s490_s4  ;;  %p496_p12 = scmp.lt.s32.totalorder %s494_s22, %s490_s4 }
  0x3d   :  { %374 = vmatpush3.bf16.msra.mxu0 %v414_v2  ;;  %382 = vmatpush3.bf16.msra.mxu1 %v417_v5 }
  0x3e   :  { %399 = vmatprep.subr.bf16.mxu0 %v523_v0  ;;  %383 = vmatprep.subr.bf16.mxu1 %v523_v0  ;;  %p497_p13 = por %p496_p12, %p495_p11 }
  0x40   :  { %376 = vmatmul.mubr.msk.bf16.vlgmr.msra.gmra.mrb[0].mxu0 %vm100_vm1, %v415_v4  ;;  %p498_p0 = pnand %p497_p13, %p491_p10 }
  0x41   :  { %401 = vmatprep.mubr.msk.bf16.mxu0 %vm524_vm0, %v523_v0  ;;  %384 = vmatpush3.bf16.msra.mxu1 %v418_v6 }
  0x42   :  { %385 = vmatprep.subr.bf16.mxu1 %v523_v0 }
  0x45   :  { %386 = vmatpush3.bf16.msra.mxu1 %v419_v7 }
  0x46   :  { %387 = vmatprep.subr.bf16.mxu1 %v523_v0 }
  0x49   :  { %388 = vmatpush3.bf16.msra.mxu1 %v420_v8 }
  0x4a   :  { %389 = vmatprep.subr.bf16.mxu1 %v523_v0 }
  0x4d   :  { %390 = vmatpush3.bf16.msra.mxu1 %v421_v9 }
  0x4e   :  { %391 = vmatprep.subr.bf16.mxu1 %v523_v0 }
  0x51   :  { %392 = vmatpush3.bf16.msra.mxu1 %v422_v10 }
  0x52   :  { %393 = vmatprep.subr.bf16.mxu1 %v523_v0 }
  0x55   :  { %394 = vmatpush3.bf16.msra.mxu1 %v423_v11 }
 0x113   :  { %v138_v13 = vpop.f32.mrb[0].mxu0 }
 0x114   :  { %v139_v14 = vadd.f32 %v343_v12, %v138_v13  ;;  %v377_v15 = vpop.f32.mrb[1].mxu0 }
 0x115   :  { %v141_v16 = vpop.f32.mrb[2].mxu0 }
 0x116   :  { %v145_v17 = vmax.f32 %v139_v14, 0.0  ;;  %v142_v18 = vadd.f32 %v343_v12, %v141_v16  ;;  %v378_v19 = vpop.f32.mrb[3].mxu0 }
 0x118   :  { %v147_v20 = vrot.slane %v145_v17, 4  ;;  %v146_v21 = vmax.f32 %v142_v18, 0.0 }
 0x11a   :  { %v148_v22 = vadd.f32 %v147_v20, %v145_v17  ;;  %v153_v23 = vrot.slane %v146_v21, 4 }
 0x11c   :  { %v149_v24 = vrot.slane %v148_v22, 2  ;;  %v154_v25 = vadd.f32 %v153_v23, %v146_v21 }
 0x11e   :  { %v150_v26 = vadd.f32 %v149_v24, %v148_v22  ;;  %v155_v27 = vrot.slane %v154_v25, 2 }
 0x120   :  { %v151_v28 = vrot.slane %v150_v26, 1  ;;  %v156_v29 = vadd.f32 %v155_v27, %v154_v25 }
 0x122   :  { %v152_v30 = vadd.f32 %v151_v28, %v150_v26  ;;  %v157_v31 = vrot.slane %v156_v29, 1 }
 0x124   :  { %v159_v32 = vpack.c.bf16 %v152_v30, %v152_v30  ;;  %v158_v33 = vadd.f32 %v157_v31, %v156_v29 }
 0x126   :  { %v160_v34 = vpack.c.bf16 %v158_v33, %v158_v33  ;;  %v186_v35 = vunpack.c.l.b16 %v159_v32 }
 0x128   :  { %v187_v36 = vunpack.c.l.b16 %v160_v34 }
 0x12a   :  { %v189_v37 = vsel %vm188_vm2, %v187_v36, %v186_v35 }
 0x12b   :  { %v190_v38 = vpack.c.b16 %v189_v37, %v189_v37 }
 0x12d   :  { %396 = vmatmul.mubr.bf16.vlgmr.msra.gmra.mrb[0].mxu1 %v190_v38 }
 0x200   :  { %v274_v40 = vpop.f32.mrb[0].mxu1 }
 0x201   :  { %v275_v41 = vadd.f32 %v348_v39, %v274_v40  ;;  %v397_v42 = vpop.f32.mrb[1].mxu1 }
 0x202   :  { %v277_v43 = vpop.f32.mrb[2].mxu1 }
 0x203   :  { %v280_v44 = vmax.f32 %v275_v41, 0.0  ;;  %v398_v45 = vpop.f32.mrb[3].mxu1 }
 0x205   :  { %v282_v46 = vpack.c.bf16 %v280_v44, %v280_v44 }
 0x207   :  { %400 = vmatpush3.bf16.xpose.msra.mxu0 %v282_v46 }
 0x20e   :  { %402 = vmatmul.mubr.bf16.vlgmr.msra.gmra.mrb[4].mxu0 %v281_v47 }
 0x2e1   :  { %v319_v49 = vpop.f32.mrb[4].mxu0 }
 0x2e2   :  { %v320_v50 = vadd.f32 %v319_v49, %v284_v48  ;;  %v403_v51 = vpop.f32.mrb[5].mxu0 }
 0x2e3   :  { %v322_v52 = vpop.f32.mrb[6].mxu0 }
 0x2e4   :  { %v404_v53 = vpop.f32.mrb[7].mxu0  ;;  %326 = vst.msk [vmem:[#allocation9] sm:$0x1] %vm325_vm3, %v320_v50 }
 0x2e5   :  { %501 = shalt.err (!%p498_p0)
}
 0x2e6   :  { %s502_s23 = scalar_lea.hbm %s652_s7, 16 }
 0x2e7   :  { %p503_p1 = scmp.ne.s32.totalorder %s652_s7, %s502_s23  ;;  %p506_p2 = scmp.lt.u32.totalorder %s502_s23, %s652_s7 }
 0x2e9   :  { %p508_p3 = pnand %p506_p2, %p503_p1 }
 0x2eb   :  { %511 = shalt.err (!%p508_p3)
}
 0x2ec   :  { %336 = dma.vmem_to_hbm [thread:$0]  %s334_s21, 16, %s652_s7, [#allocation5]  }
 0x2ed   :  { %516 = dma.done.wait [#allocation5], 16  }
 0x2ee   :  { %517 = vsyncadd [#allocation5], 4294967280 }
 0x2ef   :  { %340 = vsyncpa [#allocation4], 1 }
 0x2f0   :  { %341 = vsyncpa [#allocation7], 1 }
 0x2f1   :  { %342 = vsyncpa [#allocation5], 1 }

</bundles_post_ra>
